<compile_context>
chip_gen: v7x
topology: tpu7x:2x2x1
jax: 0.10.0
libtpu: 0.0.40
codegen_flags: <defaults>
</compile_context>

<pallas_src>
import jax
import jax.numpy as jnp
from jax.experimental import pallas as pl
from jax.experimental.pallas import tpu as pltpu

HIDDEN = 128


def _round_up(n, m):
    return ((n + m - 1) // m) * m


def _choose_tile(B):
    """Batch tile (rows). Single block for small B; ~4 parallel blocks (multiple
    of 128, capped at 4096) for large B so v7x's 2 TCs both get work and the
    double-buffered x tile + f32 intermediates stay well under scoped VMEM."""
    if B <= 2048:
        return int(_round_up(B, 8))
    return int(min(4096, _round_up(pl.cdiv(B, 4), 128)))


def value_net_kernel(x_ref, w1_ref, b1_ref, w2_ref, b2_ref, w3_ref, b3_ref, o_ref):
    # fc1 + ReLU : cast x to bf16 in-kernel, f32 MXU accumulation.
    x_b = x_ref[...].astype(jnp.bfloat16)                       # (tb, D)
    h1 = jnp.dot(x_b, w1_ref[...], preferred_element_type=jnp.float32)
    h1 = jnp.maximum(h1 + b1_ref[...], 0.0)                     # (tb, 128) f32
    # fc2 + ReLU
    h2 = jnp.dot(h1.astype(jnp.bfloat16), w2_ref[...],
                 preferred_element_type=jnp.float32)
    h2 = jnp.maximum(h2 + b2_ref[...], 0.0)                     # (tb, 128) f32
    # fc3 (128 -> 1): MXU contraction producing a lane-dense (1, tb) row
    # (avoids XLU cross-lane reduce and width-1 masked stores).
    s = jax.lax.dot_general(
        w3_ref[...], h2.astype(jnp.bfloat16),
        dimension_numbers=(((1,), (1,)), ((), ())),
        preferred_element_type=jnp.float32)                     # (1, tb)
    o_ref[...] = (s + b3_ref[0]).astype(o_ref.dtype)


def prepare_params(params, input_dim):
    """One-time glue: transpose to (in, out), cast matmul operands to bf16."""
    assert params["w1"].shape == (HIDDEN, input_dim), params["w1"].shape
    assert params["w2"].shape == (HIDDEN, HIDDEN), params["w2"].shape
    assert params["w3"].shape == (1, HIDDEN), params["w3"].shape
    return {
        "w1": params["w1"].T.astype(jnp.bfloat16),                   # (D, 128)
        "b1": params["b1"].reshape(1, HIDDEN).astype(jnp.float32),   # (1, 128)
        "w2": params["w2"].T.astype(jnp.bfloat16),                   # (128, 128)
        "b2": params["b2"].reshape(1, HIDDEN).astype(jnp.float32),   # (1, 128)
        "w3": params["w3"].reshape(1, HIDDEN).astype(jnp.bfloat16),  # (1, 128)
        "b3": params["b3"].reshape(1).astype(jnp.float32),           # (1,) SMEM scalar
    }


@jax.jit
def value_network_forward(x, prep):
    """x: (B, input_dim) float32; prep: output of prepare_params()."""
    B, D = x.shape
    tb = _choose_tile(B)
    num_tiles = int(pl.cdiv(B, tb))

    const = lambda shape: pl.BlockSpec(shape, lambda i: (0, 0))   # VMEM-resident

    out_row = pl.pallas_call(
        value_net_kernel,
        out_shape=jax.ShapeDtypeStruct((1, num_tiles * tb), jnp.float32),
        grid=(num_tiles,),
        in_specs=[
            pl.BlockSpec((tb, D), lambda i: (i, 0)),              # x tile (pipelined)
            const((D, HIDDEN)),                                   # w1
            const((1, HIDDEN)),                                   # b1
            const((HIDDEN, HIDDEN)),                              # w2
            const((1, HIDDEN)),                                   # b2
            const((1, HIDDEN)),                                   # w3 row
            pl.BlockSpec(memory_space=pltpu.MemorySpace.SMEM),    # b3 scalar
        ],
        out_specs=pl.BlockSpec((1, tb), lambda i: (0, i)),        # lane-dense output row
        compiler_params=pltpu.CompilerParams(
            dimension_semantics=("parallel",)),
    )(x, prep["w1"], prep["b1"], prep["w2"], prep["b2"],
      prep["w3"], prep["b3"])

    return out_row[0, :B].reshape(B, 1)


def init_params(key, input_dim, hidden=HIDDEN):
    """Deterministic init mimicking torch.nn.Linear default (uniform +/- 1/sqrt(fan_in))."""
    ks = jax.random.split(key, 6)

    def linear_init(kw, kb, fan_in, fan_out):
        bound = 1.0 / jnp.sqrt(fan_in)
        w = jax.random.uniform(kw, (fan_out, fan_in), jnp.float32, -bound, bound)
        b = jax.random.uniform(kb, (fan_out,), jnp.float32, -bound, bound)
        return w, b

    w1, b1 = linear_init(ks[0], ks[1], input_dim, hidden)
    w2, b2 = linear_init(ks[2], ks[3], hidden, hidden)
    w3, b3 = linear_init(ks[4], ks[5], hidden, 1)
    return {"w1": w1, "b1": b1, "w2": w2, "b2": b2, "w3": w3, "b3": b3}


def reference_forward(x, p):
    h1 = jnp.maximum(x @ p["w1"].T + p["b1"], 0.0)
    h2 = jnp.maximum(h1 @ p["w2"].T + p["b2"], 0.0)
    return h2 @ p["w3"].T + p["b3"]


if __name__ == "__main__":
    key = jax.random.PRNGKey(0)
    k_x, k_p, k_x2 = jax.random.split(key, 3)

    batch, input_dim = 8, 32
    x = jax.random.normal(k_x, (batch, input_dim), dtype=jnp.float32)
    params = init_params(k_p, input_dim)
    prep = prepare_params(params, input_dim)

    # Small-batch check (single grid step, block == full array).
    out = jax.block_until_ready(value_network_forward(x, prep))
    ref = reference_forward(x, params)
    assert out.shape == (batch, 1), out.shape
    assert jnp.allclose(out, ref, atol=3e-2, rtol=3e-2), "mismatch vs reference (small batch)"

    # Larger batch exercises the multi-tile grid + ragged last input block.
    batch2 = 3000
    x2 = jax.random.normal(k_x2, (batch2, input_dim), dtype=jnp.float32)
    out2 = jax.block_until_ready(value_network_forward(x2, prep))
    ref2 = reference_forward(x2, params)
    assert out2.shape == (batch2, 1), out2.shape
    assert jnp.allclose(out2, ref2, atol=3e-2, rtol=3e-2), "mismatch vs reference (large batch)"

    print("KERNEL_OK")
</pallas_src>

<mosaic_0001>
module attributes {stable_mosaic.version = 11 : i64} {
  func.func @value_net_kernel(%arg0: i32, %arg1: memref<8x32xf32, #tpu.memory_space<vmem>>, %arg2: memref<32x128xbf16, #tpu.memory_space<vmem>>, %arg3: memref<1x128xf32, #tpu.memory_space<vmem>>, %arg4: memref<128x128xbf16, #tpu.memory_space<vmem>>, %arg5: memref<1x128xf32, #tpu.memory_space<vmem>>, %arg6: memref<1x128xbf16, #tpu.memory_space<vmem>>, %arg7: memref<1xf32, #tpu.memory_space<smem>>, %arg8: memref<1x8xf32, #tpu.memory_space<vmem>>) attributes {dimension_semantics = [#tpu.dimension_semantics<parallel>], iteration_bounds = array<i64: 1>, scalar_prefetch = 0 : i64, scratch_operands = 0 : i64, tpu.core_type = #tpu.core_type<tc>, window_params = [{transform_indices = @transform_0, window_bounds = array<i64: 8, 32>}, {pipeline_mode = #tpu.pipeline_mode<synchronous>, transform_indices = @transform_1, window_bounds = array<i64: 32, 128>}, {pipeline_mode = #tpu.pipeline_mode<synchronous>, transform_indices = @transform_2, window_bounds = array<i64: 1, 128>}, {pipeline_mode = #tpu.pipeline_mode<synchronous>, transform_indices = @transform_3, window_bounds = array<i64: 128, 128>}, {pipeline_mode = #tpu.pipeline_mode<synchronous>, transform_indices = @transform_4, window_bounds = array<i64: 1, 128>}, {pipeline_mode = #tpu.pipeline_mode<synchronous>, transform_indices = @transform_5, window_bounds = array<i64: 1, 128>}, {transform_indices = @transform_6, window_bounds = array<i64: 1>}, {transform_indices = @transform_7, window_bounds = array<i64: 1, 8>}]} {
    %c0 = arith.constant 0 : index
    %c0_0 = arith.constant 0 : index
    %0 = vector.load %arg1[%c0, %c0_0] : memref<8x32xf32, #tpu.memory_space<vmem>>, vector<8x32xf32>
    %1 = arith.truncf %0 : vector<8x32xf32> to vector<8x32xbf16>
    %c0_1 = arith.constant 0 : index
    %c0_2 = arith.constant 0 : index
    %2 = vector.load %arg2[%c0_1, %c0_2] : memref<32x128xbf16, #tpu.memory_space<vmem>>, vector<32x128xbf16>
    %cst = arith.constant dense<0.000000e+00> : vector<8x128xf32>
    %3 = tpu.matmul %1, %2, %cst {dimension_numbers = #tpu.dot_dimension_numbers<[1], [0], [0], [1], [0, 0, 1, 1], [], []>} : vector<8x32xbf16>, vector<32x128xbf16>, vector<8x128xf32> -> vector<8x128xf32>
    %c0_3 = arith.constant 0 : index
    %c0_4 = arith.constant 0 : index
    %4 = vector.load %arg3[%c0_3, %c0_4] : memref<1x128xf32, #tpu.memory_space<vmem>>, vector<1x128xf32>
    %5 = vector.broadcast %4 : vector<1x128xf32> to vector<8x128xf32>
    %6 = arith.addf %3, %5 : vector<8x128xf32>
    %cst_5 = arith.constant 0.000000e+00 : f32
    %7 = vector.broadcast %cst_5 : f32 to vector<8x128xf32>
    %8 = arith.maximumf %6, %7 : vector<8x128xf32>
    %9 = arith.truncf %8 : vector<8x128xf32> to vector<8x128xbf16>
    %c0_6 = arith.constant 0 : index
    %c0_7 = arith.constant 0 : index
    %10 = vector.load %arg4[%c0_6, %c0_7] : memref<128x128xbf16, #tpu.memory_space<vmem>>, vector<128x128xbf16>
    %cst_8 = arith.constant dense<0.000000e+00> : vector<8x128xf32>
    %11 = tpu.matmul %9, %10, %cst_8 {dimension_numbers = #tpu.dot_dimension_numbers<[1], [0], [0], [1], [0, 0, 1, 1], [], []>} : vector<8x128xbf16>, vector<128x128xbf16>, vector<8x128xf32> -> vector<8x128xf32>
    %c0_9 = arith.constant 0 : index
    %c0_10 = arith.constant 0 : index
    %12 = vector.load %arg5[%c0_9, %c0_10] : memref<1x128xf32, #tpu.memory_space<vmem>>, vector<1x128xf32>
    %13 = vector.broadcast %12 : vector<1x128xf32> to vector<8x128xf32>
    %14 = arith.addf %11, %13 : vector<8x128xf32>
    %cst_11 = arith.constant 0.000000e+00 : f32
    %15 = vector.broadcast %cst_11 : f32 to vector<8x128xf32>
    %16 = arith.maximumf %14, %15 : vector<8x128xf32>
    %c0_12 = arith.constant 0 : index
    %c0_13 = arith.constant 0 : index
    %17 = vector.load %arg6[%c0_12, %c0_13] : memref<1x128xbf16, #tpu.memory_space<vmem>>, vector<1x128xbf16>
    %18 = arith.truncf %16 : vector<8x128xf32> to vector<8x128xbf16>
    %cst_14 = arith.constant dense<0.000000e+00> : vector<1x8xf32>
    %19 = tpu.matmul %17, %18, %cst_14 {dimension_numbers = #tpu.dot_dimension_numbers<[1], [1], [0], [0], [0, 0, 1, 0], [], []>} : vector<1x128xbf16>, vector<8x128xbf16>, vector<1x8xf32> -> vector<1x8xf32>
    %c0_15 = arith.constant 0 : index
    %20 = memref.load %arg7[%c0_15] : memref<1xf32, #tpu.memory_space<smem>>
    %21 = vector.broadcast %20 : f32 to vector<1x8xf32>
    %22 = arith.addf %19, %21 : vector<1x8xf32>
    %c0_16 = arith.constant 0 : index
    %c0_17 = arith.constant 0 : index
    %23 = vector.load %arg8[%c0_16, %c0_17] : memref<1x8xf32, #tpu.memory_space<vmem>>, vector<1x8xf32>
    tpu.vector_store %arg8[%c0_16, %c0_17], %22 {strides = array<i32>} : memref<1x8xf32, #tpu.memory_space<vmem>>, vector<1x8xf32>,
    return
  }
  func.func @transform_0(%arg0: i32) -> (i32, i32) {
    %c0_i32 = arith.constant 0 : i32
    %c0_i32_0 = arith.constant 0 : i32
    return %arg0, %c0_i32 : i32, i32
  }
  func.func @transform_1(%arg0: i32) -> (i32, i32) {
    %c0_i32 = arith.constant 0 : i32
    %c0_i32_0 = arith.constant 0 : i32
    %c0_i32_1 = arith.constant 0 : i32
    return %c0_i32, %c0_i32_0 : i32, i32
  }
  func.func @transform_2(%arg0: i32) -> (i32, i32) {
    %c0_i32 = arith.constant 0 : i32
    %c0_i32_0 = arith.constant 0 : i32
    %c0_i32_1 = arith.constant 0 : i32
    return %c0_i32, %c0_i32_0 : i32, i32
  }
  func.func @transform_3(%arg0: i32) -> (i32, i32) {
    %c0_i32 = arith.constant 0 : i32
    %c0_i32_0 = arith.constant 0 : i32
    %c0_i32_1 = arith.constant 0 : i32
    return %c0_i32, %c0_i32_0 : i32, i32
  }
  func.func @transform_4(%arg0: i32) -> (i32, i32) {
    %c0_i32 = arith.constant 0 : i32
    %c0_i32_0 = arith.constant 0 : i32
    %c0_i32_1 = arith.constant 0 : i32
    return %c0_i32, %c0_i32_0 : i32, i32
  }
  func.func @transform_5(%arg0: i32) -> (i32, i32) {
    %c0_i32 = arith.constant 0 : i32
    %c0_i32_0 = arith.constant 0 : i32
    %c0_i32_1 = arith.constant 0 : i32
    return %c0_i32, %c0_i32_0 : i32, i32
  }
  func.func @transform_6(%arg0: i32) -> i32 {
    %c0_i32 = arith.constant 0 : i32
    %c0_i32_0 = arith.constant 0 : i32
    return %c0_i32 : i32
  }
  func.func @transform_7(%arg0: i32) -> (i32, i32) {
    %c0_i32 = arith.constant 0 : i32
    %c0_i32_0 = arith.constant 0 : i32
    return %c0_i32, %arg0 : i32, i32
  }
}

</mosaic_0001>

<bundles_post_ra>
// kernel: value_network_forward.1
= control target key start
LH: loop header
LB: loop body
LE: loop exit
PB: predicated region body
PF: predicated region fallthrough
CT: control target
= control target key end

     0   :  { %13 = vsyncpa [#allocation4], 0  ;;  %s603_s0 = inlined_call_operand.hbm [shape: f32[8,32], index: 0, kind: input, shape index: {}]   ;;  %s604_s1 = inlined_call_operand.hbm [shape: bf16[32,128], index: 1, kind: input, shape index: {}]   ;;  %s605_s2 = inlined_call_operand.vmem [shape: f32[1,128], index: 2, kind: input, shape index: {}]   ;;  %s606_s3 = inlined_call_operand.hbm [shape: bf16[128,128], index: 3, kind: input, shape index: {}]   ;;  %s607_s4 = inlined_call_operand.vmem [shape: f32[1,128], index: 4, kind: input, shape index: {}]   ;;  %s608_s5 = inlined_call_operand.vmem [shape: bf16[1,128], index: 5, kind: input, shape index: {}]   ;;  %s609_s6 = inlined_call_operand.<no memory space> [shape: f32[1], index: 6, kind: input, shape index: {}]   ;;  %s610_s7 = inlined_call_operand.hbm [shape: f32[1,8], index: 7, kind: output, shape index: {}]  }
   0x1   :  { %14 = vsyncpa [#allocation7], 0 }
   0x2   :  { %15 = vsyncpa [#allocation5], 0  ;;  %s486_s24 = smov [#allocation6]   ;;  %s392_s28 = scalar_lea.hbm %s604_s1, 256 }
   0x3   :  { %s31_s25 = sshll.u32 %s486_s24, 4  ;;  %p393_p0 = scmp.ne.s32.totalorder %s604_s1, %s392_s28  ;;  %s32_s25 = int_to_ptr.vmem [resolvable:$true] %s31_s25 }
   0x4   :  { %p396_p1 = scmp.lt.u32.totalorder %s392_s28, %s604_s1 }
   0x6   :  { %p398_p2 = pnand %p396_p1, %p393_p0 }
   0x8   :  { %401 = shalt.err (!%p398_p2)
}
   0x9   :  { %s402_s10 = scalar_lea.vmem %s32_s25, 256  ;;  %p407_p4 = scmp.lt.s32.totalorder %s32_s25, %s32_s25 }
   0xa   :  { %p403_p3 = scmp.ne.s32.totalorder %s32_s25, %s402_s10  ;;  %p408_p5 = scmp.lt.s32.totalorder %s402_s10, %s402_s10 }
   0xc   :  { %p409_p6 = por %p408_p5, %p407_p4 }
   0xe   :  { %p410_p7 = pnand %p409_p6, %p403_p3 }
  0x10   :  { %413 = shalt.err (!%p410_p7)
}
  0x11   :  { %s487_s11 = smov 64   ;;  %s488_s12 = smov 4  }
  0x12   :  { %37 = dma.hbm_to_vmem [thread:$0]  %s604_s1, 256, %s32_s25, [#allocation7], %s487_s11, %s487_s11, %s488_s12  }
  0x13   :  { %s489_s15 = smov [#allocation3]   ;;  %s490_s17 = smov [#allocation8]  }
  0x14   :  { %s22_s16 = sshll.u32 %s489_s15, 4  ;;  %s45_s18 = sshll.u32 %s490_s17, 4  ;;  %s23_s16 = int_to_ptr.vmem [resolvable:$true] %s22_s16  ;;  %s46_s18 = int_to_ptr.vmem [resolvable:$true] %s45_s18 }
  0x15   :  { %s414_s21 = scalar_lea.hbm %s603_s0, 128 }
  0x16   :  { %p415_p8 = scmp.ne.s32.totalorder %s603_s0, %s414_s21  ;;  %p418_p9 = scmp.lt.u32.totalorder %s414_s21, %s603_s0 }
  0x18   :  { %p420_p10 = pnand %p418_p9, %p415_p8 }
  0x1a   :  { %423 = shalt.err (!%p420_p10)
}
  0x1b   :  { %s424_s1 = scalar_lea.vmem %s23_s16, 128  ;;  %p429_p12 = scmp.lt.s32.totalorder %s23_s16, %s23_s16 }
  0x1c   :  { %p425_p11 = scmp.ne.s32.totalorder %s23_s16, %s424_s1  ;;  %p430_p13 = scmp.lt.s32.totalorder %s424_s1, %s424_s1 }
  0x1e   :  { %p431_p0 = por %p430_p13, %p429_p12 }
  0x20   :  { %p432_p1 = pnand %p431_p0, %p425_p11 }
  0x22   :  { %435 = shalt.err (!%p432_p1)
}
  0x23   :  { %25 = dma.hbm_to_vmem [thread:$0]  %s603_s0, 128, %s23_s16, [#allocation4]  }
  0x24   :  { %s436_s30 = scalar_lea.hbm %s606_s3, 1024 }
  0x25   :  { %p437_p2 = scmp.ne.s32.totalorder %s606_s3, %s436_s30  ;;  %p440_p3 = scmp.lt.u32.totalorder %s436_s30, %s606_s3 }
  0x27   :  { %p442_p4 = pnand %p440_p3, %p437_p2 }
  0x29   :  { %445 = shalt.err (!%p442_p4)
}
  0x2a   :  { %s446_s14 = scalar_lea.vmem %s46_s18, 1024  ;;  %p451_p6 = scmp.lt.s32.totalorder %s46_s18, %s46_s18 }
  0x2b   :  { %p447_p5 = scmp.ne.s32.totalorder %s46_s18, %s446_s14  ;;  %p452_p7 = scmp.lt.s32.totalorder %s446_s14, %s446_s14 }
  0x2d   :  { %p453_p8 = por %p452_p7, %p451_p6 }
  0x2f   :  { %p454_p9 = pnand %p453_p8, %p447_p5 }
  0x31   :  { %457 = shalt.err (!%p454_p9)
}
  0x32   :  { %51 = dma.hbm_to_vmem [thread:$0]  %s606_s3, 1024, %s46_s18, [#allocation7], %s487_s11, %s487_s11, %s488_s12  }
  0x33   :  { %480 = dma.done.wait [#allocation4], 128  }
  0x34   :  { %481 = vsyncadd [#allocation4], 4294967168 }
  0x35   :  { %482 = dma.done.wait [#allocation7], 1280  }
  0x36   :  { %483 = vsyncadd [#allocation7], 4294966016  ;;  %v491_v0 = vmov 0.0   ;;  %vm492_vm0 = vmmov 0   ;;  %v382_v1 = vld [vmem:[#allocation6] sm:$0xff]   ;;  %v383_v2 = vld [vmem:[#allocation6 + $0x8] sm:$0xff]   ;;  %v254_v30 = vstv %s609_s6 }
  0x37   :  { %340 = vmatprep.subr.bf16.mxu0 %v491_v0  ;;  %344 = vmatprep.mubr.msk.bf16.mxu0 %vm492_vm0, %v491_v0  ;;  %v68_v3 = vld [vmem:[#allocation3] sm:$0xff]  ;;  %v384_v4 = vld [vmem:[#allocation8] sm:$0xff]   ;;  %vm93_vm1 = vcmask 261120   ;;  %v386_v7 = vld [vmem:[#allocation8 + $0x10] sm:$0xff]   ;;  %s493_s20 = smov [#allocation9]   ;;  %vm295_vm2 = vcmask 57344  }
  0x38   :  { %348 = vmatprep.subr.bf16.mxu1 %v491_v0  ;;  %364 = vmatprep.mubr.msk.bf16.mxu1 %vm492_vm0, %v491_v0  ;;  %v69_v5 = vpack.c.bf16 %v68_v3, %v68_v3  ;;  %v385_v6 = vld [vmem:[#allocation8 + $0x8] sm:$0xff]   ;;  %v387_v8 = vld [vmem:[#allocation8 + $0x18] sm:$0xff]   ;;  %v388_v9 = vld [vmem:[#allocation8 + $0x20] sm:$0xff]   ;;  %s303_s21 = sshll.u32 %s493_s20, 4  ;;  %s304_s21 = int_to_ptr.vmem [resolvable:$true] %s303_s21 }
  0x39   :  { %341 = vmatpush3.bf16.msra.mxu0 %v382_v1  ;;  %349 = vmatpush3.bf16.msra.mxu1 %v384_v4  ;;  %v389_v10 = vld [vmem:[#allocation8 + $0x28] sm:$0xff]   ;;  %v390_v11 = vld [vmem:[#allocation8 + $0x30] sm:$0xff]   ;;  %v391_v12 = vld [vmem:[#allocation8 + $0x38] sm:$0xff]   ;;  %s462_s22 = scalar_lea.vmem %s304_s21, 32  ;;  %p463_p11 = scmp.lt.s32.totalorder %s304_s21, %s304_s21 }
  0x3a   :  { %342 = vmatprep.subr.bf16.mxu0 %v491_v0  ;;  %350 = vmatprep.subr.bf16.mxu1 %v491_v0  ;;  %v313_v13 = vld [vmem:[%s605_s2] ss:$0 sm:$0xff] }
  0x3b   :  { %v317_v21 = vld [vmem:[%s607_s4] ss:$0 sm:$0xff]  ;;  %s458_s4 = scalar_lea.vmem %s304_s21, 16 }
  0x3c   :  { %v251_v29 = vld [vmem:[%s608_s5] sm:$0x1]  ;;  %p459_p10 = scmp.ne.s32.totalorder %s304_s21, %s458_s4  ;;  %p464_p12 = scmp.lt.s32.totalorder %s462_s22, %s458_s4 }
  0x3d   :  { %343 = vmatpush3.bf16.msra.mxu0 %v383_v2  ;;  %351 = vmatpush3.bf16.msra.mxu1 %v385_v6 }
  0x3e   :  { %368 = vmatprep.subr.bf16.mxu0 %v491_v0  ;;  %352 = vmatprep.subr.bf16.mxu1 %v491_v0  ;;  %p465_p13 = por %p464_p12, %p463_p11 }
  0x40   :  { %345 = vmatmul.mubr.msk.bf16.vlgmr.msra.gmra.mrb[0].mxu0 %vm93_vm1, %v69_v5  ;;  %p466_p0 = pnand %p465_p13, %p459_p10 }
  0x41   :  { %370 = vmatprep.mubr.msk.bf16.mxu0 %vm492_vm0, %v491_v0  ;;  %353 = vmatpush3.bf16.msra.mxu1 %v386_v7 }
  0x42   :  { %354 = vmatprep.subr.bf16.mxu1 %v491_v0 }
  0x45   :  { %355 = vmatpush3.bf16.msra.mxu1 %v387_v8 }
  0x46   :  { %356 = vmatprep.subr.bf16.mxu1 %v491_v0 }
  0x49   :  { %357 = vmatpush3.bf16.msra.mxu1 %v388_v9 }
  0x4a   :  { %358 = vmatprep.subr.bf16.mxu1 %v491_v0 }
  0x4d   :  { %359 = vmatpush3.bf16.msra.mxu1 %v389_v10 }
  0x4e   :  { %360 = vmatprep.subr.bf16.mxu1 %v491_v0 }
  0x51   :  { %361 = vmatpush3.bf16.msra.mxu1 %v390_v11 }
  0x52   :  { %362 = vmatprep.subr.bf16.mxu1 %v491_v0 }
  0x55   :  { %363 = vmatpush3.bf16.msra.mxu1 %v391_v12 }
 0x113   :  { %v131_v14 = vpop.f32.mrb[0].mxu0 }
 0x114   :  { %v132_v15 = vadd.f32 %v313_v13, %v131_v14  ;;  %v346_v16 = vpop.f32.mrb[1].mxu0 }
 0x115   :  { %v134_v17 = vpop.f32.mrb[2].mxu0 }
 0x116   :  { %v137_v18 = vmax.f32 %v132_v15, 0.0  ;;  %v347_v19 = vpop.f32.mrb[3].mxu0 }
 0x118   :  { %v138_v20 = vpack.c.bf16 %v137_v18, %v137_v18 }
 0x11a   :  { %365 = vmatmul.mubr.bf16.vlgmr.msra.gmra.mrb[0].mxu1 %v138_v20 }
 0x1ed   :  { %v244_v22 = vpop.f32.mrb[0].mxu1 }
 0x1ee   :  { %v245_v23 = vadd.f32 %v317_v21, %v244_v22  ;;  %v366_v24 = vpop.f32.mrb[1].mxu1 }
 0x1ef   :  { %v247_v25 = vpop.f32.mrb[2].mxu1 }
 0x1f0   :  { %v250_v26 = vmax.f32 %v245_v23, 0.0  ;;  %v367_v27 = vpop.f32.mrb[3].mxu1 }
 0x1f2   :  { %v252_v28 = vpack.c.bf16 %v250_v26, %v250_v26 }
 0x1f4   :  { %369 = vmatpush3.bf16.xpose.msra.mxu0 %v252_v28 }
 0x1fb   :  { %371 = vmatmul.mubr.bf16.vlgmr.msra.gmra.mrb[4].mxu0 %v251_v29 }
 0x2ce   :  { %v289_v31 = vpop.f32.mrb[4].mxu0 }
 0x2cf   :  { %v290_v32 = vadd.f32 %v289_v31, %v254_v30  ;;  %v372_v33 = vpop.f32.mrb[5].mxu0 }
 0x2d0   :  { %v292_v34 = vpop.f32.mrb[6].mxu0 }
 0x2d1   :  { %v373_v35 = vpop.f32.mrb[7].mxu0  ;;  %296 = vst.msk [vmem:[#allocation9] sm:$0x1] %vm295_vm2, %v290_v32 }
 0x2d2   :  { %469 = shalt.err (!%p466_p0)
}
 0x2d3   :  { %s470_s23 = scalar_lea.hbm %s610_s7, 16 }
 0x2d4   :  { %p471_p1 = scmp.ne.s32.totalorder %s610_s7, %s470_s23  ;;  %p474_p2 = scmp.lt.u32.totalorder %s470_s23, %s610_s7 }
 0x2d6   :  { %p476_p3 = pnand %p474_p2, %p471_p1 }
 0x2d8   :  { %479 = shalt.err (!%p476_p3)
}
 0x2d9   :  { %306 = dma.vmem_to_hbm [thread:$0]  %s304_s21, 16, %s610_s7, [#allocation5]  }
 0x2da   :  { %484 = dma.done.wait [#allocation5], 16  }
 0x2db   :  { %485 = vsyncadd [#allocation5], 4294967280 }
 0x2dc   :  { %310 = vsyncpa [#allocation4], 1 }
 0x2dd   :  { %311 = vsyncpa [#allocation7], 1 }
 0x2de   :  { %312 = vsyncpa [#allocation5], 1 }

</bundles_post_ra>
